<compile_context>
chip_gen: v7x
topology: tpu7x:2x2x1
jax: 0.10.0
libtpu: 0.0.40
codegen_flags: <defaults>
</compile_context>

<pallas_src>
import jax
import jax.numpy as jnp
from jax import lax
from jax.experimental import pallas as pl
from jax.experimental.pallas import tpu as pltpu


def _round_up(x, m):
    return ((x + m - 1) // m) * m


def _cdiv(a, b):
    return -(-a // b)


def _make_kernel(hw_total, tile_hw):
    rem_hw = hw_total % tile_hw  # static; nonzero => ragged last HW tile

    def kernel(x_ref, wf_ref, bf_ref, wc_ref, bc_ref, out_ref, acc_ref):
        # x_ref:  [ROWS_B, C, TILE_HW]  input tile (original dtype)
        # wf_ref: [C, F]   w_feat / (H*W), f32 (mean folded into the weight)
        # bf_ref: [1, F]   feature-projection bias
        # wc_ref: [1, F]   classification-head weight (row vector)
        # bc_ref: [1, 1]   classification-head bias
        # out_ref:[ROWS_B, 1]
        # acc_ref:[ROWS_B, C] f32  spatial-sum accumulator (VMEM scratch)
        k = pl.program_id(1)

        @pl.when(k == 0)
        def _():
            acc_ref[...] = jnp.zeros_like(acc_ref)

        x = x_ref[...].astype(jnp.float32)
        if rem_hw:
            # Zero-mask out-of-bounds lanes of the ragged last HW tile so the
            # spatial sum stays exact (no padded copy of x in HBM).
            col = lax.broadcasted_iota(jnp.int32, x.shape, 2)
            valid = jnp.logical_or(k != pl.num_programs(1) - 1, col < rem_hw)
            x = jnp.where(valid, x, 0.0)

        acc_ref[...] += jnp.sum(x, axis=-1)                      # [ROWS_B, C]

        @pl.when(k == pl.num_programs(1) - 1)
        def _():
            # feat = mean_pooled @ w_feat + b  (mean folded into wf_ref)
            feat = jnp.dot(acc_ref[...], wf_ref[...],
                           preferred_element_type=jnp.float32) + bf_ref[...]
            feat = jnp.maximum(feat, 0.0)                        # ReLU
            # classification_network = nn.Linear(F, 1): N=1 matmul as reduce.
            logits = jnp.sum(feat * wc_ref[...], axis=-1,
                             keepdims=True) + bc_ref[...]        # [ROWS_B, 1]
            out_ref[...] = logits.astype(out_ref.dtype)

    return kernel


def model_forward(x_nchw, w_feat, b_feat, w_cls, b_cls, *,
                  tile_hw_target=8192, tile_bytes_target=4 << 20):
    """x_nchw: [B, C, H, W] (f32 or bf16). Returns [B, 1] float32."""
    B, C, H, W = x_nchw.shape
    F = w_feat.shape[1]
    HW = H * W
    itemsize = jnp.dtype(x_nchw.dtype).itemsize

    # ---- spatial tiling: multiple of 128 lanes, large blocks ---------------
    tile_hw = min(tile_hw_target, _round_up(HW, 128))

    # ---- batch tiling: aim for multi-MiB x tiles ---------------------------
    bytes_per_b = C * tile_hw * itemsize
    rows_b = max(1, min(128, tile_bytes_target // bytes_per_b))
    rows_b = min(B, rows_b)
    if rows_b < B:
        # Multi-block row axis: output block needs rows_b % 8 == 0.
        rows_b = max(8, (rows_b // 8) * 8)
        if rows_b >= B:
            rows_b = B
    # v7x megacore: try to give both TensorCores a row block when B is large.
    if rows_b == B and B >= 16:
        half = _round_up(_cdiv(B, 2), 8)
        if half < B:
            rows_b = half
    # Keep the double-buffered x tile within a conservative VMEM budget
    # (safe on v5e 16 MiB / v7x 32 MiB scoped defaults even before the raise).
    while rows_b * C * tile_hw * itemsize > (6 << 20) and tile_hw > 512:
        tile_hw = _round_up(tile_hw // 2, 128)

    n_rb = _cdiv(B, rows_b)
    n_hw = _cdiv(HW, tile_hw)
    b_out = n_rb * rows_b

    # ---- host-side prep (no padded copy of x; reshape is free) -------------
    x3 = x_nchw.reshape(B, C, HW)
    wf_scaled = w_feat.astype(jnp.float32) / float(HW)           # [C, F]
    bf2 = b_feat.reshape(1, F).astype(jnp.float32)
    wc_row = w_cls.reshape(1, F).astype(jnp.float32)
    bc2 = b_cls.reshape(1, 1).astype(jnp.float32)

    kernel = _make_kernel(HW, tile_hw)

    cost = pl.CostEstimate(
        flops=B * C * HW + 2 * B * C * F + 3 * B * F,
        transcendentals=0,
        bytes_accessed=(x3.size * itemsize
                        + (wf_scaled.size + bf2.size + wc_row.size
                           + bc2.size) * 4
                        + b_out * 4),
    )

    out_pad = pl.pallas_call(
        kernel,
        out_shape=jax.ShapeDtypeStruct((b_out, 1), jnp.float32),
        grid_spec=pltpu.PrefetchScalarGridSpec(
            num_scalar_prefetch=0,
            grid=(n_rb, n_hw),
            in_specs=[
                pl.BlockSpec((rows_b, C, tile_hw), lambda i, k: (i, 0, k)),
                pl.BlockSpec((C, F), lambda i, k: (0, 0)),       # wf_scaled
                pl.BlockSpec((1, F), lambda i, k: (0, 0)),       # b_feat
                pl.BlockSpec((1, F), lambda i, k: (0, 0)),       # w_cls row
                pl.BlockSpec((1, 1), lambda i, k: (0, 0)),       # b_cls
            ],
            out_specs=pl.BlockSpec((rows_b, 1), lambda i, k: (i, 0)),
            scratch_shapes=[pltpu.VMEM((rows_b, C), jnp.float32)],
        ),
        compiler_params=pltpu.CompilerParams(
            dimension_semantics=("parallel", "arbitrary"),
            vmem_limit_bytes=32 * 1024 * 1024,
        ),
        cost_estimate=cost,
    )(x3, wf_scaled, bf2, wc_row, bc2)

    return out_pad[:B]


def _reference(x_nchw, w_feat, b_feat, w_cls, b_cls):
    pooled = jnp.mean(x_nchw.astype(jnp.float32), axis=(2, 3))
    feat = jnp.maximum(pooled @ w_feat + b_feat, 0.0)
    return feat @ w_cls + b_cls


if __name__ == "__main__":
    # Small shapes consistent with the module's forward:
    #   X: [B, C, H, W], feature_vec_size = F.
    B, C, H, W = 2, 4, 16, 16
    F = 32

    key = jax.random.PRNGKey(0)
    kx, kwf, kbf, kwc, kbc = jax.random.split(key, 5)

    x = jax.random.normal(kx, (B, C, H, W), dtype=jnp.float32)

    # Deterministic parameter init (synthetic; not a checkpoint load).
    w_feat = jax.random.normal(kwf, (C, F), dtype=jnp.float32) * 0.1
    b_feat = jax.random.normal(kbf, (F,), dtype=jnp.float32) * 0.01
    w_cls = jax.random.normal(kwc, (F, 1), dtype=jnp.float32) * 0.1
    b_cls = jax.random.normal(kbc, (1,), dtype=jnp.float32) * 0.01

    out = model_forward(x, w_feat, b_feat, w_cls, b_cls)
    out = jax.block_until_ready(out)

    ref = _reference(x, w_feat, b_feat, w_cls, b_cls)
    assert out.shape == (B, 1), out.shape
    assert jnp.allclose(out, ref, atol=1e-5, rtol=1e-5), (out, ref)

    print("KERNEL_OK")
</pallas_src>

<mosaic_0001>
module attributes {stable_mosaic.version = 11 : i64} {
  func.func @kernel(%arg0: i32, %arg1: i32, %arg2: memref<2x4x256xf32, #tpu.memory_space<vmem>>, %arg3: memref<4x32xf32, #tpu.memory_space<vmem>>, %arg4: memref<1x32xf32, #tpu.memory_space<vmem>>, %arg5: memref<1x32xf32, #tpu.memory_space<vmem>>, %arg6: memref<1x1xf32, #tpu.memory_space<vmem>>, %arg7: memref<2x1xf32, #tpu.memory_space<vmem>>, %arg8: memref<2x4xf32, #tpu.memory_space<vmem>>) attributes {dimension_semantics = [#tpu.dimension_semantics<parallel>, #tpu.dimension_semantics<arbitrary>], iteration_bounds = array<i64: 1, 1>, scalar_prefetch = 0 : i64, scratch_operands = 1 : i64, tpu.core_type = #tpu.core_type<tc>, window_params = [{transform_indices = @transform_0, window_bounds = array<i64: 2, 4, 256>}, {pipeline_mode = #tpu.pipeline_mode<synchronous>, transform_indices = @transform_1, window_bounds = array<i64: 4, 32>}, {pipeline_mode = #tpu.pipeline_mode<synchronous>, transform_indices = @transform_2, window_bounds = array<i64: 1, 32>}, {pipeline_mode = #tpu.pipeline_mode<synchronous>, transform_indices = @transform_3, window_bounds = array<i64: 1, 32>}, {pipeline_mode = #tpu.pipeline_mode<synchronous>, transform_indices = @transform_4, window_bounds = array<i64: 1, 1>}, {transform_indices = @transform_5, window_bounds = array<i64: 2, 1>}]} {
    %c0_i32 = arith.constant 0 : i32
    %0 = arith.cmpi eq, %arg1, %c0_i32 : i32
    %1 = arith.extui %0 : i1 to i32
    %c0_i32_0 = arith.constant 0 : i32
    %2 = arith.cmpi ne, %1, %c0_i32_0 : i32
    scf.if %2 {
      %cst_9 = arith.constant 0.000000e+00 : f32
      %11 = vector.broadcast %cst_9 : f32 to vector<2x4xf32>
      %c0_10 = arith.constant 0 : index
      %c0_11 = arith.constant 0 : index
      %12 = vector.load %arg8[%c0_10, %c0_11] : memref<2x4xf32, #tpu.memory_space<vmem>>, vector<2x4xf32>
      tpu.vector_store %arg8[%c0_10, %c0_11], %11 {strides = array<i32>} : memref<2x4xf32, #tpu.memory_space<vmem>>, vector<2x4xf32>,
    } else {
    }
    %c0 = arith.constant 0 : index
    %c0_1 = arith.constant 0 : index
    %c0_2 = arith.constant 0 : index
    %3 = vector.load %arg2[%c0, %c0_1, %c0_2] : memref<2x4x256xf32, #tpu.memory_space<vmem>>, vector<2x4x256xf32>
    %c0_3 = arith.constant 0 : index
    %c0_4 = arith.constant 0 : index
    %4 = vector.load %arg8[%c0_3, %c0_4] : memref<2x4xf32, #tpu.memory_space<vmem>>, vector<2x4xf32>
    %cst = arith.constant dense<0.000000e+00> : vector<2x4xf32>
    %5 = vector.multi_reduction <add>, %3, %cst [2] : vector<2x4x256xf32> to vector<2x4xf32>
    %6 = arith.addf %4, %5 : vector<2x4xf32>
    %c0_5 = arith.constant 0 : index
    %c0_6 = arith.constant 0 : index
    %7 = vector.load %arg8[%c0_5, %c0_6] : memref<2x4xf32, #tpu.memory_space<vmem>>, vector<2x4xf32>
    tpu.vector_store %arg8[%c0_5, %c0_6], %6 {strides = array<i32>} : memref<2x4xf32, #tpu.memory_space<vmem>>, vector<2x4xf32>,
    %c0_i32_7 = arith.constant 0 : i32
    %8 = arith.cmpi eq, %arg1, %c0_i32_7 : i32
    %9 = arith.extui %8 : i1 to i32
    %c0_i32_8 = arith.constant 0 : i32
    %10 = arith.cmpi ne, %9, %c0_i32_8 : i32
    scf.if %10 {
      %c0_9 = arith.constant 0 : index
      %c0_10 = arith.constant 0 : index
      %11 = vector.load %arg8[%c0_9, %c0_10] : memref<2x4xf32, #tpu.memory_space<vmem>>, vector<2x4xf32>
      %c0_11 = arith.constant 0 : index
      %c0_12 = arith.constant 0 : index
      %12 = vector.load %arg3[%c0_11, %c0_12] : memref<4x32xf32, #tpu.memory_space<vmem>>, vector<4x32xf32>
      %cst_13 = arith.constant dense<0.000000e+00> : vector<2x32xf32>
      %13 = tpu.matmul %11, %12, %cst_13 {dimension_numbers = #tpu.dot_dimension_numbers<[1], [0], [0], [1], [0, 0, 1, 1], [], []>} : vector<2x4xf32>, vector<4x32xf32>, vector<2x32xf32> -> vector<2x32xf32>
      %c0_14 = arith.constant 0 : index
      %c0_15 = arith.constant 0 : index
      %14 = vector.load %arg4[%c0_14, %c0_15] : memref<1x32xf32, #tpu.memory_space<vmem>>, vector<1x32xf32>
      %15 = vector.broadcast %14 : vector<1x32xf32> to vector<2x32xf32>
      %16 = arith.addf %13, %15 : vector<2x32xf32>
      %cst_16 = arith.constant 0.000000e+00 : f32
      %17 = vector.broadcast %cst_16 : f32 to vector<2x32xf32>
      %18 = arith.maximumf %16, %17 : vector<2x32xf32>
      %c0_17 = arith.constant 0 : index
      %c0_18 = arith.constant 0 : index
      %19 = vector.load %arg5[%c0_17, %c0_18] : memref<1x32xf32, #tpu.memory_space<vmem>>, vector<1x32xf32>
      %20 = vector.broadcast %19 : vector<1x32xf32> to vector<2x32xf32>
      %21 = arith.mulf %18, %20 : vector<2x32xf32>
      %cst_19 = arith.constant dense<0.000000e+00> : vector<2xf32>
      %22 = vector.multi_reduction <add>, %21, %cst_19 [1] : vector<2x32xf32> to vector<2xf32>
      %23 = vector.shape_cast %22 : vector<2xf32> to vector<2x1xf32>
      %c0_20 = arith.constant 0 : index
      %c0_21 = arith.constant 0 : index
      %24 = vector.load %arg6[%c0_20, %c0_21] : memref<1x1xf32, #tpu.memory_space<vmem>>, vector<1x1xf32>
      %25 = vector.broadcast %24 : vector<1x1xf32> to vector<2x1xf32>
      %26 = arith.addf %23, %25 : vector<2x1xf32>
      %c0_22 = arith.constant 0 : index
      %c0_23 = arith.constant 0 : index
      %27 = vector.load %arg7[%c0_22, %c0_23] : memref<2x1xf32, #tpu.memory_space<vmem>>, vector<2x1xf32>
      tpu.vector_store %arg7[%c0_22, %c0_23], %26 {strides = array<i32>} : memref<2x1xf32, #tpu.memory_space<vmem>>, vector<2x1xf32>,
    } else {
    }
    return
  }
  func.func @transform_0(%arg0: i32, %arg1: i32) -> (i32, i32, i32) {
    %c0_i32 = arith.constant 0 : i32
    %c0_i32_0 = arith.constant 0 : i32
    return %arg0, %c0_i32, %arg1 : i32, i32, i32
  }
  func.func @transform_1(%arg0: i32, %arg1: i32) -> (i32, i32) {
    %c0_i32 = arith.constant 0 : i32
    %c0_i32_0 = arith.constant 0 : i32
    %c0_i32_1 = arith.constant 0 : i32
    return %c0_i32, %c0_i32_0 : i32, i32
  }
  func.func @transform_2(%arg0: i32, %arg1: i32) -> (i32, i32) {
    %c0_i32 = arith.constant 0 : i32
    %c0_i32_0 = arith.constant 0 : i32
    %c0_i32_1 = arith.constant 0 : i32
    return %c0_i32, %c0_i32_0 : i32, i32
  }
  func.func @transform_3(%arg0: i32, %arg1: i32) -> (i32, i32) {
    %c0_i32 = arith.constant 0 : i32
    %c0_i32_0 = arith.constant 0 : i32
    %c0_i32_1 = arith.constant 0 : i32
    return %c0_i32, %c0_i32_0 : i32, i32
  }
  func.func @transform_4(%arg0: i32, %arg1: i32) -> (i32, i32) {
    %c0_i32 = arith.constant 0 : i32
    %c0_i32_0 = arith.constant 0 : i32
    %c0_i32_1 = arith.constant 0 : i32
    return %c0_i32, %c0_i32_0 : i32, i32
  }
  func.func @transform_5(%arg0: i32, %arg1: i32) -> (i32, i32) {
    %c0_i32 = arith.constant 0 : i32
    %c0_i32_0 = arith.constant 0 : i32
    return %arg0, %c0_i32 : i32, i32
  }
}

</mosaic_0001>

<bundles_post_ra>
// kernel: tpu_custom_call.1
= control target key start
LH: loop header
LB: loop body
LE: loop exit
PB: predicated region body
PF: predicated region fallthrough
CT: control target
= control target key end

     0   :  { %s309_s0 = inlined_call_operand.hbm [shape: f32[2,4,256], index: 0, kind: input, shape index: {}]   ;;  %s310_s1 = inlined_call_operand.vmem [shape: f32[4,32], index: 1, kind: input, shape index: {}]   ;;  %s311_s2 = inlined_call_operand.vmem [shape: f32[1,32], index: 2, kind: input, shape index: {}]   ;;  %s312_s3 = inlined_call_operand.vmem [shape: f32[1,32], index: 3, kind: input, shape index: {}]   ;;  %s313_s4 = inlined_call_operand.<no memory space> [shape: f32[1,1], index: 4, kind: input, shape index: {}]   ;;  %s314_s5 = inlined_call_operand.vmem [shape: f32[2,1], index: 5, kind: output, shape index: {}]  }
   0x1   :  { %v10_v0 = vstv %s313_s4 }
   0x2   :  { %11 = vst [vmem:[#allocation3] sm:$0x1] %v10_v0 }
   0x3   :  { %12 = vsyncpa [#allocation5], 0  ;;  %s240_s20 = smov [#allocation4]   ;;  %s216_s24 = scalar_lea.hbm %s309_s0, 256 }
   0x4   :  { %s18_s21 = sshll.u32 %s240_s20, 4  ;;  %p217_p0 = scmp.ne.s32.totalorder %s309_s0, %s216_s24  ;;  %s19_s21 = int_to_ptr.vmem [resolvable:$true] %s18_s21 }
   0x5   :  { %p220_p1 = scmp.lt.u32.totalorder %s216_s24, %s309_s0 }
   0x7   :  { %p222_p2 = pnand %p220_p1, %p217_p0 }
   0x9   :  { %225 = shalt.err (!%p222_p2)
}
   0xa   :  { %s226_s4 = scalar_lea.vmem %s19_s21, 256  ;;  %p231_p4 = scmp.lt.s32.totalorder %s19_s21, %s19_s21 }
   0xb   :  { %p227_p3 = scmp.ne.s32.totalorder %s19_s21, %s226_s4  ;;  %p232_p5 = scmp.lt.s32.totalorder %s226_s4, %s226_s4 }
   0xd   :  { %p233_p6 = por %p232_p5, %p231_p4 }
   0xf   :  { %p234_p7 = pnand %p233_p6, %p227_p3 }
  0x11   :  { %237 = shalt.err (!%p234_p7)
}
  0x12   :  { %s241_s29 = smov 128   ;;  %s242_s30 = smov 8  }
  0x13   :  { %24 = dma.hbm_to_vmem [thread:$0]  %s309_s0, 256, %s19_s21, [#allocation5], %s241_s29, %s241_s29, %s242_s30  }
  0x14   :  { %238 = dma.done.wait [#allocation5], 256  }
  0x15   :  { %239 = vsyncadd [#allocation5], 4294967040  ;;  %vm51_vm0 = vcmask 1043456   ;;  %v42_v1 = vld [vmem:[#allocation4] sm:$0xff]  ;;  %v43_v2 = vld [vmem:[#allocation4 + $0x8] sm:$0xff]  ;;  %vm40_vm1 = vcmask 25600   ;;  %v64_v13 = vlaneseq }
  0x16   :  { %v47_v3 = vcombine.high %v42_v1, %v42_v1  ;;  %v52_v4 = vsel %vm51_vm0, %v42_v1, 0.0  ;;  %v48_v5 = vcombine.high %v43_v2, %v43_v2  ;;  %v57_v7 = vsel %vm51_vm0, %v43_v2, 0.0  ;;  %v84_v12 = vld [vmem:[%s310_s1] sm:$0xf] }
  0x17   :  { %v243_v11 = vmov 0.0   ;;  %vm244_vm2 = vmmov 0   ;;  %v65_v14 = vand.u32 127, %v64_v13  ;;  %v67_v15 = vshrl.u32 %v64_v13, 7  ;;  %v197_v25 = vld [vmem:[%s311_s2] ss:$0 sm:$0xff] }
  0x18   :  { %v53_v6 = vsel %vm51_vm0, %v47_v3, 0.0  ;;  %v58_v8 = vsel %vm51_vm0, %v48_v5, 0.0  ;;  %41 = vst.msk [vmem:[#allocation2] sm:$0x3] %vm40_vm1, %v243_v11  ;;  %204 = vmatprep.subr.mxu0 %v243_v11  ;;  %206 = vmatprep.mubr.msk.f32.mxu0 %vm244_vm2, %v243_v11  ;;  %vm74_vm3 = vcmask 1041409   ;;  %vm92_vm4 = vcmask 31744  }
  0x19   :  { %v54_v9 = vadd.f32 %v53_v6, %v52_v4  ;;  %v59_v10 = vadd.f32 %v58_v8, %v57_v7  ;;  %205 = vmatpush3.msk.msra.mxu0 %vm51_vm0, %v84_v12  ;;  %v68_v17 = vsub.s32 %v65_v14, %v67_v15  ;;  %v200_v29 = vld [vmem:[%s312_s3] ss:$0 sm:$0xff]  ;;  %vm178_vm5 = vcmask 254976   ;;  %v201_v33 = vld [vmem:[#allocation3] ss:$0 sm:$0xff] }
  0x1a   :  { %vm190_vm6 = vcmask 1024  }
  0x1b   :  { %55 = vadd.xlane.f32.xlu0 %v54_v9 }
  0x1f   :  { %60 = vadd.xlane.f32.xlu0 %v59_v10  ;;  %v44_v21 = vld [vmem:[#allocation2] sm:$0x3] }
  0xa8   :  { %v56_v16 = vpop.xlane.xlu0 %55 }
  0xa9   :  { %v69_v19 = vrot.slane %v56_v16, %v68_v17 }
  0xac   :  { %v61_v18 = vpop.xlane.xlu0 %60 }
  0xad   :  { %v73_v20 = vrot.slane %v61_v18, %v68_v17 }
  0xaf   :  { %v75_v22 = vsel %vm74_vm3, %v73_v20, %v69_v19 }
  0xb0   :  { %v77_v23 = vadd.f32 %v75_v22, %v44_v21 }
  0xb2   :  { %79 = vst.msk [vmem:[#allocation2] sm:$0x3] %vm40_vm1, %v77_v23 }
  0xb9   :  { %v83_v24 = vld [vmem:[#allocation2] sm:$0x3] }
  0xba   :  { %207 = vmatmul.mubr.msk.f32.vlgmr.msra.gmra.mrb[0].mxu0 %vm92_vm4, %v83_v24 }
 0x18d   :  { %v165_v26 = vpop.f32.mrb[0].mxu0 }
 0x18e   :  { %v166_v27 = vadd.f32 %v197_v25, %v165_v26  ;;  %v208_v28 = vpop.f32.mrb[1].mxu0 }
 0x190   :  { %v169_v30 = vmax.f32 %v166_v27, 0.0 }
 0x192   :  { %v177_v31 = vmul.f32 %v200_v29, %v169_v30 }
 0x194   :  { %v179_v32 = vsel %vm178_vm5, %v177_v31, 0.0 }
 0x195   :  { %180 = vadd.xlane.f32.xlu1 %v179_v32 }
 0x222   :  { %v181_v34 = vpop.xlane.xlu1 %180 }
 0x223   :  { %v189_v35 = vadd.f32 %v201_v33, %v181_v34 }
 0x225   :  { %191 = vst.msk [vmem:[%s314_s5] sm:$0x3] %vm190_vm6, %v189_v35 }
 0x226   :  { %196 = vsyncpa [#allocation5], 1 }

</bundles_post_ra>
